<compile_context>
chip_gen: v7x
topology: tpu7x:2x2x1
jax: 0.10.0
libtpu: 0.0.40
codegen_flags: <defaults>
</compile_context>

<pallas_src>
import jax
import jax.numpy as jnp
import numpy as np
from jax.experimental import pallas as pl
from jax.experimental.pallas import tpu as pltpu

# Deterministic "parameters" (the module hardcodes these, requires_grad=False).
_KERNEL_X = np.array([[-1.0, 0.0, 1.0],
                      [-2.0, 0.0, 2.0],
                      [-1.0, 0.0, 1.0]], dtype=np.float32)
_KERNEL_Y = np.array([[1.0, 2.0, 1.0],
                      [0.0, 0.0, 0.0],
                      [-1.0, -2.0, -1.0]], dtype=np.float32)


def _sobelxy_kernel(x_ref, o_ref):
    """x_ref / o_ref: (B, H, W) — B whole (padded) image planes per grid step."""
    x = x_ref[...].astype(jnp.float32)        # no-op for f32; upcast for bf16 I/O
    _, H, W = x.shape

    # Lane-boundary masks from a tiny (1,1,W) iota (broadcast inside the select).
    col = jax.lax.broadcasted_iota(jnp.int32, (1, 1, W), 2)
    has_left = col > 0
    has_right = col < W - 1

    # Horizontal neighbours with F.conv2d(padding=1)'s zero boundary.
    x_l = jnp.where(has_left, pltpu.roll(x, shift=1, axis=2), 0.0)        # x[., c-1]
    x_r = jnp.where(has_right, pltpu.roll(x, shift=W - 1, axis=2), 0.0)   # x[., c+1]

    sm = x_l + (x + x) + x_r       # horizontal [1, 2, 1] smoothing
    dh = x_r - x_l                 # horizontal [-1, 0, 1] difference

    # Bulk: circular (unmasked) vertical rolls; rows 0 and H-1 are fixed below.
    sm_u = pltpu.roll(sm, shift=1, axis=1)        # sm[r-1]   (row 0 wraps)
    sm_d = pltpu.roll(sm, shift=H - 1, axis=1)    # sm[r+1]   (row H-1 wraps)
    dh_u = pltpu.roll(dh, shift=1, axis=1)
    dh_d = pltpu.roll(dh, shift=H - 1, axis=1)

    gx = dh_u + (dh + dh) + dh_d   # Sobel-x = vertical [1,2,1] of horizontal diff
    gy = sm_u - sm_d               # Sobel-y = vertical [1,0,-1] of horizontal smooth
    o_ref[...] = (jnp.abs(gx) + jnp.abs(gy)).astype(o_ref.dtype)

    # Boundary fix-up (zero padding above row 0 / below row H-1): (B,1,W) slivers
    # written AFTER the bulk store; sm/dh already carry the column zero-boundary,
    # so corners get both corrections.
    dh0 = dh[:, 0:1, :]
    dh1 = dh[:, 1:2, :]
    sm1 = sm[:, 1:2, :]
    o_ref[:, 0:1, :] = (jnp.abs(dh0 + dh0 + dh1) + jnp.abs(sm1)).astype(o_ref.dtype)

    dhA = dh[:, H - 2:H - 1, :]
    dhB = dh[:, H - 1:H, :]
    smA = sm[:, H - 2:H - 1, :]
    o_ref[:, H - 1:H, :] = (jnp.abs(dhA + dhB + dhB) + jnp.abs(smA)).astype(o_ref.dtype)


def _vmem_capacity_bytes():
    """Per-core VMEM capacity; conservative fallback if the query is unavailable."""
    try:
        cap = getattr(pltpu.get_tpu_info(), "vmem_capacity_bytes", None)
        if cap:
            return int(cap)
    except Exception:
        pass
    return 64 << 20   # v7x per-core VMEM (smallest of the current generations)


def _pick_plane_batch(nc, plane_bytes, tile_budget_bytes):
    """Largest divisor of nc whose input tile fits the budget while keeping
    enough grid steps for per-core pipelining (>= 4 steps covers v7x's two
    TensorCores under dimension_semantics=("parallel",))."""
    budget_planes = max(1, tile_budget_bytes // max(plane_bytes, 1))
    min_steps = 4 if nc >= 4 else (2 if nc >= 2 else 1)
    best = 1
    for d in range(1, nc + 1):
        if nc % d or d > budget_planes or nc // d < min_steps:
            continue
        best = d
    return best


@jax.jit
def sobelxy(x):
    """x: (N, 1, H, W) -> |Sobel_x(x)| + |Sobel_y(x)|, same shape/dtype.

    bf16 input is accepted (math runs in f32, output follows x.dtype); it halves
    HBM traffic and is the preferred path on HBM-bound v5e/v6e.
    """
    N, C, H, W = x.shape
    if C != 1:
        raise ValueError("Sobelxy expects single-channel input (weights are (1,1,3,3)).")
    nc = N * C
    x3 = x.reshape(nc, H, W)

    # Zero-pad H to a multiple of 8 and W to a multiple of 128 so loads/stores are
    # sublane/lane dense (unmasked vst).  The zero pad reproduces conv2d's
    # padding=1 at the true boundary; padded rows/cols are sliced off below.
    ph, pw = (-H) % 8, (-W) % 128
    if ph or pw:
        x3 = jnp.pad(x3, ((0, 0), (0, ph), (0, pw)))
    Hp, Wp = H + ph, W + pw

    vmem_cap = _vmem_capacity_bytes()
    # ~4 MiB of input per step on v7x (64 MiB VMEM), ~8 MiB on v5e/v6e (128 MiB).
    tile_budget = max(2 << 20, min(8 << 20, vmem_cap // 16))
    plane_bytes = Hp * Wp * x3.dtype.itemsize
    b_blk = _pick_plane_batch(nc, plane_bytes, tile_budget)

    # Scoped-VMEM cap: 2x(in)+2x(out) pipeline buffers plus ~6 live f32
    # temporaries, with slack; stays within physical VMEM on every generation
    # but above v5e's 16 MiB scoped default.
    blk_io = b_blk * plane_bytes
    blk_f32 = b_blk * Hp * Wp * 4
    vmem_limit = int(max(32 << 20,
                         min(4 * blk_io + 6 * blk_f32 + (2 << 20),
                             vmem_cap * 3 // 4)))

    out = pl.pallas_call(
        _sobelxy_kernel,
        out_shape=jax.ShapeDtypeStruct((nc, Hp, Wp), x.dtype),
        grid_spec=pltpu.PrefetchScalarGridSpec(
            num_scalar_prefetch=0,
            grid=(nc // b_blk,),
            in_specs=[pl.BlockSpec((b_blk, Hp, Wp), lambda b: (b, 0, 0))],
            out_specs=pl.BlockSpec((b_blk, Hp, Wp), lambda b: (b, 0, 0)),
        ),
        compiler_params=pltpu.CompilerParams(
            dimension_semantics=("parallel",),
            vmem_limit_bytes=vmem_limit),
    )(x3)

    if ph or pw:
        out = out[:, :H, :W]
    return out.reshape(N, C, H, W)


def _sobelxy_ref(x):
    """Pure-JAX reference using lax conv (cross-correlation like F.conv2d)."""
    kx = jnp.asarray(_KERNEL_X).reshape(1, 1, 3, 3)
    ky = jnp.asarray(_KERNEL_Y).reshape(1, 1, 3, 3)
    dn = jax.lax.conv_dimension_numbers(x.shape, kx.shape, ("NCHW", "OIHW", "NCHW"))
    sx = jax.lax.conv_general_dilated(x, kx, (1, 1), [(1, 1), (1, 1)], dimension_numbers=dn)
    sy = jax.lax.conv_general_dilated(x, ky, (1, 1), [(1, 1), (1, 1)], dimension_numbers=dn)
    return jnp.abs(sx) + jnp.abs(sy)


if __name__ == "__main__":
    key = jax.random.PRNGKey(0)
    for shape in [(4, 1, 64, 128),   # already lane/sublane aligned, 4 parallel grid steps
                  (2, 1, 16, 16),    # W padded 16 -> 128 (lane-dense store path)
                  (1, 1, 17, 96)]:   # both H (17 -> 24) and W (96 -> 128) padded
        key, sub = jax.random.split(key)
        x = jax.random.normal(sub, shape, dtype=jnp.float32)
        out = jax.block_until_ready(sobelxy(x))
        ref = _sobelxy_ref(x)
        np.testing.assert_allclose(np.asarray(out), np.asarray(ref),
                                   rtol=1e-5, atol=1e-5)
    print("KERNEL_OK")
</pallas_src>

<mosaic_0001>
module attributes {stable_mosaic.version = 11 : i64} {
  func.func @_sobelxy_kernel(%arg0: i32, %arg1: memref<1x64x128xf32, #tpu.memory_space<vmem>>, %arg2: memref<1x64x128xf32, #tpu.memory_space<vmem>>) attributes {dimension_semantics = [#tpu.dimension_semantics<parallel>], iteration_bounds = array<i64: 4>, scalar_prefetch = 0 : i64, scratch_operands = 0 : i64, tpu.core_type = #tpu.core_type<tc>, window_params = [{transform_indices = @transform_0, window_bounds = array<i64: 1, 64, 128>}, {transform_indices = @transform_1, window_bounds = array<i64: 1, 64, 128>}]} {
    %c0 = arith.constant 0 : index
    %c0_0 = arith.constant 0 : index
    %c0_1 = arith.constant 0 : index
    %0 = vector.load %arg1[%c0, %c0_0, %c0_1] : memref<1x64x128xf32, #tpu.memory_space<vmem>>, vector<1x64x128xf32>
    %1 = tpu.iota {dimensions = array<i32: 2>} : vector<1x1x128xi32>
    %c0_i32 = arith.constant 0 : i32
    %2 = vector.broadcast %c0_i32 : i32 to vector<1x1x128xi32>
    %3 = arith.cmpi sgt, %1, %2 : vector<1x1x128xi32>
    %c127_i32 = arith.constant 127 : i32
    %4 = vector.broadcast %c127_i32 : i32 to vector<1x1x128xi32>
    %5 = arith.cmpi slt, %1, %4 : vector<1x1x128xi32>
    %c1_i32 = arith.constant 1 : i32
    %6 = tpu.dynamic_rotate %0 by %c1_i32 dim 2 : vector<1x64x128xf32>, i32 -> vector<1x64x128xf32>
    %cst = arith.constant 0.000000e+00 : f32
    %7 = vector.shape_cast %3 : vector<1x1x128xi1> to vector<1x1x128xi1>
    %8 = vector.broadcast %7 : vector<1x1x128xi1> to vector<1x64x128xi1>
    %9 = vector.broadcast %cst : f32 to vector<1x64x128xf32>
    %10 = arith.select %8, %6, %9 : vector<1x64x128xi1>, vector<1x64x128xf32>
    %c127_i32_2 = arith.constant 127 : i32
    %11 = tpu.dynamic_rotate %0 by %c127_i32_2 dim 2 : vector<1x64x128xf32>, i32 -> vector<1x64x128xf32>
    %cst_3 = arith.constant 0.000000e+00 : f32
    %12 = vector.shape_cast %5 : vector<1x1x128xi1> to vector<1x1x128xi1>
    %13 = vector.broadcast %12 : vector<1x1x128xi1> to vector<1x64x128xi1>
    %14 = vector.broadcast %cst_3 : f32 to vector<1x64x128xf32>
    %15 = arith.select %13, %11, %14 : vector<1x64x128xi1>, vector<1x64x128xf32>
    %16 = arith.addf %0, %0 : vector<1x64x128xf32>
    %17 = arith.addf %10, %16 : vector<1x64x128xf32>
    %18 = arith.addf %17, %15 : vector<1x64x128xf32>
    %19 = arith.subf %15, %10 : vector<1x64x128xf32>
    %c1_i32_4 = arith.constant 1 : i32
    %20 = tpu.dynamic_rotate %18 by %c1_i32_4 dim 1 : vector<1x64x128xf32>, i32 -> vector<1x64x128xf32>
    %c63_i32 = arith.constant 63 : i32
    %21 = tpu.dynamic_rotate %18 by %c63_i32 dim 1 : vector<1x64x128xf32>, i32 -> vector<1x64x128xf32>
    %c1_i32_5 = arith.constant 1 : i32
    %22 = tpu.dynamic_rotate %19 by %c1_i32_5 dim 1 : vector<1x64x128xf32>, i32 -> vector<1x64x128xf32>
    %c63_i32_6 = arith.constant 63 : i32
    %23 = tpu.dynamic_rotate %19 by %c63_i32_6 dim 1 : vector<1x64x128xf32>, i32 -> vector<1x64x128xf32>
    %24 = arith.addf %19, %19 : vector<1x64x128xf32>
    %25 = arith.addf %22, %24 : vector<1x64x128xf32>
    %26 = arith.addf %25, %23 : vector<1x64x128xf32>
    %27 = arith.subf %20, %21 : vector<1x64x128xf32>
    %28 = math.absf %26 : vector<1x64x128xf32>
    %29 = math.absf %27 : vector<1x64x128xf32>
    %30 = arith.addf %28, %29 : vector<1x64x128xf32>
    %c0_7 = arith.constant 0 : index
    %c0_8 = arith.constant 0 : index
    %c0_9 = arith.constant 0 : index
    %31 = vector.load %arg2[%c0_7, %c0_8, %c0_9] : memref<1x64x128xf32, #tpu.memory_space<vmem>>, vector<1x64x128xf32>
    tpu.vector_store %arg2[%c0_7, %c0_8, %c0_9], %30 {strides = array<i32>} : memref<1x64x128xf32, #tpu.memory_space<vmem>>, vector<1x64x128xf32>,
    %32 = vector.extract_strided_slice %19 {offsets = [0, 0, 0], sizes = [1, 1, 128], strides = [1, 1, 1]} : vector<1x64x128xf32> to vector<1x1x128xf32>
    %33 = vector.extract_strided_slice %19 {offsets = [0, 1, 0], sizes = [1, 1, 128], strides = [1, 1, 1]} : vector<1x64x128xf32> to vector<1x1x128xf32>
    %34 = vector.extract_strided_slice %18 {offsets = [0, 1, 0], sizes = [1, 1, 128], strides = [1, 1, 1]} : vector<1x64x128xf32> to vector<1x1x128xf32>
    %35 = arith.addf %32, %32 : vector<1x1x128xf32>
    %36 = arith.addf %35, %33 : vector<1x1x128xf32>
    %37 = math.absf %36 : vector<1x1x128xf32>
    %38 = math.absf %34 : vector<1x1x128xf32>
    %39 = arith.addf %37, %38 : vector<1x1x128xf32>
    %c0_10 = arith.constant 0 : index
    %c0_11 = arith.constant 0 : index
    %c0_12 = arith.constant 0 : index
    %40 = vector.load %arg2[%c0_10, %c0_11, %c0_12] : memref<1x64x128xf32, #tpu.memory_space<vmem>>, vector<1x1x128xf32>
    tpu.vector_store %arg2[%c0_10, %c0_11, %c0_12], %39 {strides = array<i32>} : memref<1x64x128xf32, #tpu.memory_space<vmem>>, vector<1x1x128xf32>,
    %41 = vector.extract_strided_slice %19 {offsets = [0, 62, 0], sizes = [1, 1, 128], strides = [1, 1, 1]} : vector<1x64x128xf32> to vector<1x1x128xf32>
    %42 = vector.extract_strided_slice %19 {offsets = [0, 63, 0], sizes = [1, 1, 128], strides = [1, 1, 1]} : vector<1x64x128xf32> to vector<1x1x128xf32>
    %43 = vector.extract_strided_slice %18 {offsets = [0, 62, 0], sizes = [1, 1, 128], strides = [1, 1, 1]} : vector<1x64x128xf32> to vector<1x1x128xf32>
    %44 = arith.addf %41, %42 : vector<1x1x128xf32>
    %45 = arith.addf %44, %42 : vector<1x1x128xf32>
    %46 = math.absf %45 : vector<1x1x128xf32>
    %47 = math.absf %43 : vector<1x1x128xf32>
    %48 = arith.addf %46, %47 : vector<1x1x128xf32>
    %c0_13 = arith.constant 0 : index
    %c63 = arith.constant 63 : index
    %c0_14 = arith.constant 0 : index
    %49 = vector.load %arg2[%c0_13, %c63, %c0_14] : memref<1x64x128xf32, #tpu.memory_space<vmem>>, vector<1x1x128xf32>
    tpu.vector_store %arg2[%c0_13, %c63, %c0_14], %48 {strides = array<i32>} : memref<1x64x128xf32, #tpu.memory_space<vmem>>, vector<1x1x128xf32>,
    return
  }
  func.func @transform_0(%arg0: i32) -> (i32, i32, i32) {
    %c0_i32 = arith.constant 0 : i32
    %c0_i32_0 = arith.constant 0 : i32
    %c0_i32_1 = arith.constant 0 : i32
    return %arg0, %c0_i32, %c0_i32_0 : i32, i32, i32
  }
  func.func @transform_1(%arg0: i32) -> (i32, i32, i32) {
    %c0_i32 = arith.constant 0 : i32
    %c0_i32_0 = arith.constant 0 : i32
    %c0_i32_1 = arith.constant 0 : i32
    return %arg0, %c0_i32, %c0_i32_0 : i32, i32, i32
  }
}

</mosaic_0001>

<bundles_post_ra>
// kernel: sobelxy.1
= control target key start
LH: loop header
LB: loop body
LE: loop exit
PB: predicated region body
PF: predicated region fallthrough
CT: control target
= control target key end

     0   :  { %6 = vsyncpa [#allocation3], 0  ;;  %s1033_s0 = inlined_call_operand.hbm [shape: f32[4,64,128], index: 0, kind: input, shape index: {}]   ;;  %s1034_s1 = inlined_call_operand.hbm [shape: f32[4,64,128], index: 1, kind: output, shape index: {}]  }
   0x1   :  { %8 = vsyncpa [#allocation3 + $0x1], 0 }
   0x2   :  { %9 = vsyncpa [#allocation4], 0 }
   0x3   :  { %11 = vsyncpa [#allocation4 + $0x1], 0  ;;  %s654_s6 = smov 0   ;;  %s656_s7 = smov 0  }
   0x4   :  { %s658_s8 = smov 0   ;;  %s660_s9 = smov 0  }
   0x5 LB: > { %s675_s10 = sadd.s32 4294967295, %s634_s9   ;;  %s470_s11 = sadd.s32 4294967294, %s634_s9   ;;  %s634_s9 = sphi %s660_s9, %s1046_s9   ;;  %s630_s8 = sphi %s658_s8, %s1045_s8   ;;  %s626_s7 = sphi %s656_s7, %s1044_s7   ;;  %s622_s6 = sphi %s654_s6, %s1043_s6  }
   0x6   : > { %s679_s12 = sadd.s32 1, %s634_s9   ;;  %s24_s13 = sadd.s32 1, %s630_s8 }
   0x7   : > { %s21_s14 = ssub.s32 %s634_s9, %s679_s12  ;;  %p31_p0 = scmp.ne.s32.totalorder %s630_s8, %s626_s7 }
   0x8   : > { %p22_p1 = scmp.eq.s32.totalorder %s21_s14, 0  ;;  %p32_p2 = scmp.eq.s32.totalorder %s634_s9, 0 }
   0x9   : > { %p37_p3 = scmp.ne.s32.totalorder %s626_s7, %s622_s6  ;;  %p38_p4 = scmp.eq.s32.totalorder %s675_s10, 0 }
   0xa   : > { %s691_s15 = scalar_select %p22_p1, %s630_s8, %s24_s13  }
   0xb   : > { %p693_p5 = por %p32_p2, %p31_p0  ;;  %p697_p6 = por %p38_p4, %p37_p3 }
   0xc   : > { %p61_p7 = scmp.eq.s32.totalorder %s675_s10, 3  ;;  %p67_p8 = scmp.eq.s32.totalorder %s470_s11, 3 }
   0xd   : > { %p498_p9 = scmp.lt.s32.totalorder %s634_s9, 4  ;;  %s87_s20 = sand.u32 1, %s630_s8  }
   0xe   : > { %p703_p10 = por %p61_p7, %p31_p0  ;;  %p707_p11 = por %p67_p8, %p37_p3 }
   0xf   : > { %s484_s21 = sshll.u32 %s634_s9, 10  ;;  %s473_s22 = sshll.u32 %s87_s20, 6 }
  0x10   : > { %s1038_s18 = scalar_select %p703_p10, 1, 0 }
  0x11   : > { %s1039_s19 = scalar_select %p707_p11, 1, 0 }
  0x12   : > { %s716_s25 = scalar_lea.hbm %s1033_s0, %s484_s21  ;;  %s91_s26 = scalar_lea.vmem [#allocation2], %s473_s22 }
  0x13   : > { %s98_s27 = sshll.u32 %s91_s26, 4  ;;  %p720_p12 = pnand %p498_p9, %p693_p5  ;;  %s724_s27 = int_to_ptr.vmem [resolvable:$true] %s98_s27 }
  0x14   : > { %s726_s29 = scalar_lea.sflag [#allocation3], %s87_s20  ;;  %s538_s30 = scalar_lea.hbm %s716_s25, 1024 }
  0x15   : > { %p539_p13 = scmp.ne.s32.totalorder %s716_s25, %s538_s30  ;;  %p540_p0 = pneg %p720_p12 }
  0x16   : > { %s543_s4 = scalar_lea.hbm %s1033_s0, 4096  ;;  %p544_p3 = scmp.lt.u32.totalorder %s716_s25, %s1033_s0 }
  0x17   : > { %p541_p1 = pnand %p540_p0, %p539_p13  ;;  %p545_p4 = scmp.lt.u32.totalorder %s543_s4, %s538_s30 }
  0x18   : > { %p547_p7 = scmp.lt.u32.totalorder %s538_s30, %s716_s25 }
  0x19   : > { %p542_p2 = pneg %p541_p1  ;;  %p546_p5 = por %p545_p4, %p544_p3 }
  0x1b   : > { %p548_p8 = por %p547_p7, %p546_p5 }
  0x1d   : > { %p549_p9 = pnand %p548_p8, %p542_p2 }
  0x1f   : > { %552 = shalt.err (!%p549_p9)
}
  0x20   : > { %s553_s13 = scalar_lea.vmem %s724_s27, 1024  ;;  %s636_s14 = smov [#allocation2]  }
  0x21   : > { %p554_p13 = scmp.ne.s32.totalorder %s724_s27, %s553_s13  ;;  %s558_s16 = sshll.u32 %s636_s14, 4  ;;  %s559_s16 = int_to_ptr.vmem [resolvable:$false] %s558_s16 }
  0x22   : > { %s560_s20 = scalar_lea.vmem %s559_s16, 2048  ;;  %p561_p10 = scmp.lt.s32.totalorder %s724_s27, %s559_s16 }
  0x23   : > { %p556_p1 = pnand %p554_p13, %p540_p0  ;;  %p562_p3 = scmp.lt.s32.totalorder %s560_s20, %s553_s13 }
  0x25   : > { %p557_p11 = pneg %p556_p1  ;;  %p563_p4 = por %p562_p3, %p561_p10 }
  0x27   : > { %p564_p5 = pnand %p563_p4, %p557_p11 }
  0x29   : > { %567 = shalt.err (!%p564_p5)
}
  0x2a   : > { %s637_s21 = smov 128   ;;  %s638_s22 = smov 8  }
  0x2b   : > { %493 = dma.hbm_to_vmem [thread:$0]  (!%p720_p12), %s716_s25, 1024, %s724_s27, %s726_s29, %s637_s21, %s637_s21, %s638_s22  }
  0x2c   : > { %p476_p0 = scmp.ge.s32.totalorder %s634_s9, 1  ;;  %p106_p2 = scmp.lt.s32.totalorder %s634_s9, 5 }
  0x2e   : > { %p107_p7 = pnand %p476_p0, %p106_p2 }
  0x2f   : > { %s757_s23 = sand.u32 (!%p107_p7), 1, %s626_s7  }
  0x30   : > { %110 = sbr.rel (%p107_p7) target bundleno = 241 (0xf1), region = 24  ;;  %s477_s24 = sshll.u32 (!%p107_p7), %s757_s23, 6 }
  0x31   : > { %s113_s26 = scalar_lea.sflag (!%p107_p7), [#allocation3], %s757_s23  ;;  %s116_s30 = scalar_lea.vmem (!%p107_p7), [#allocation2], %s477_s24 }
  0x37   : > { %613 = dma.done.wait (%p697_p6), %s113_s26, 1024  }
  0x38   : > { %615 = vsyncadd (%p697_p6), %s113_s26, 4294966272  ;;  %v141_v0 = vld [vmem:[%s116_s30 + $0x30] sm:$0xff]  ;;  %v135_v1 = vld [vmem:[%s116_s30] sm:$0xff]  ;;  %s639_s25 = smov 1   ;;  %s640_s27 = smov 127   ;;  %v143_v8 = vlaneseq }
  0x39   : > { %159 = vrot.lane.b32.xlu1 %v141_v0, %s639_s25  ;;  %147 = vrot.lane.b32.xlu0 %v135_v1, %s639_s25  ;;  %v142_v2 = vld [vmem:[%s116_s30 + $0x38] sm:$0xff]  ;;  %v136_v3 = vld [vmem:[%s116_s30 + $0x8] sm:$0xff]  ;;  %v205_v14 = vadd.f32 %v141_v0, %v141_v0  ;;  %v199_v15 = vadd.f32 %v135_v1, %v135_v1  ;;  %s870_s17 = scalar_lea.vmem [#allocation5], %s477_s24  ;;  %s485_s28 = sshll.u32 %s675_s10, 10 }
  0x3a   : > { %v137_v4 = vld [vmem:[%s116_s30 + $0x10] sm:$0xff]  ;;  %v139_v5 = vld [vmem:[%s116_s30 + $0x20] sm:$0xff]  ;;  %v138_v6 = vld [vmem:[%s116_s30 + $0x18] sm:$0xff]  ;;  %v767_v9 = vand.u32 127, %v143_v8  ;;  %v775_v18 = vshrl.u32 %v143_v8, 7  ;;  %v206_v25 = vadd.f32 %v142_v2, %v142_v2  ;;  %v200_v26 = vadd.f32 %v136_v3, %v136_v3  ;;  %s397_s29 = sshll.u32 %s870_s17, 4  ;;  %s985_s4 = scalar_lea.hbm %s1034_s1, %s485_s28  ;;  %s987_s29 = int_to_ptr.vmem [resolvable:$true] %s397_s29 }
  0x3b   : > { %v140_v7 = vld [vmem:[%s116_s30 + $0x28] sm:$0xff]  ;;  %v201_v33 = vadd.f32 %v137_v4, %v137_v4  ;;  %v795_v36 = vadd.f32 %v139_v5, %v139_v5  ;;  %v202_v37 = vadd.f32 %v138_v6, %v138_v6  ;;  %s384_s10 = scalar_lea.sflag [#allocation4], %s757_s23  ;;  %s568_s5 = scalar_lea.vmem %s987_s29, 1024 }
  0x3c   : > { %vm145_vm0 = vcmp.gt.s32.totalorder %v767_v9, 0  ;;  %vm146_vm1 = vcmp.lt.s32.totalorder %v767_v9, 127  ;;  %vm241_vm2 = vcmp.lt.s32.totalorder %v775_v18, 1  ;;  %vm258_vm3 = vcmp.lt.s32.totalorder %v775_v18, 7  ;;  %p569_p6 = scmp.ne.s32.totalorder %s987_s29, %s568_s5  ;;  %p1041_p10 = scmp.ne.s32.totalorder %s1038_s18, 0 }
  0x3d   : > { %161 = vrot.lane.b32.xlu1 %v142_v2, %s639_s25  ;;  %149 = vrot.lane.b32.xlu0 %v136_v3, %s639_s25  ;;  %v797_v38 = vadd.f32 %v140_v7, %v140_v7  ;;  %s641_s11 = smov [#allocation5]  }
  0x3e   : > { %p570_p11 = pnand %p569_p6, %p1041_p10  ;;  %s572_s13 = sshll.u32 %s641_s11, 4  ;;  %s573_s13 = int_to_ptr.vmem [resolvable:$false] %s572_s13 }
  0x3f   : > { %s574_s14 = scalar_lea.vmem %s573_s13, 2048  ;;  %p575_p8 = scmp.lt.s32.totalorder %s987_s29, %s573_s13 }
  0x40   : > { %p571_p12 = pneg %p570_p11  ;;  %p576_p9 = scmp.lt.s32.totalorder %s574_s14, %s568_s5 }
  0x41   : > { %185 = vrot.lane.b32.xlu1 %v141_v0, %s640_s27  ;;  %173 = vrot.lane.b32.xlu0 %v135_v1, %s640_s27 }
  0x42   : > { %p577_p13 = por %p576_p9, %p575_p8 }
  0x44   : > { %p578_p1 = pnand %p577_p13, %p571_p12 }
  0x45   : > { %151 = vrot.lane.b32.xlu1 %v137_v4, %s639_s25  ;;  %187 = vrot.lane.b32.xlu0 %v142_v2, %s640_s27 }
  0x49   : > { %155 = vrot.lane.b32.xlu1 %v139_v5, %s639_s25  ;;  %153 = vrot.lane.b32.xlu0 %v138_v6, %s639_s25 }
  0x4d   : > { %175 = vrot.lane.b32.xlu1 %v136_v3, %s640_s27  ;;  %157 = vrot.lane.b32.xlu0 %v140_v7, %s639_s25 }
  0x51   : > { %179 = vrot.lane.b32.xlu1 %v138_v6, %s640_s27  ;;  %177 = vrot.lane.b32.xlu0 %v137_v4, %s640_s27 }
  0x55   : > { %183 = vrot.lane.b32.xlu1 %v140_v7, %s640_s27  ;;  %181 = vrot.lane.b32.xlu0 %v139_v5, %s640_s27 }
  0xab   : > { %v160_v10 = vpop.permute.xlu1 %159  ;;  %v148_v11 = vpop.permute.xlu0 %147 }
  0xac   : > { %v171_v16 = vsel %vm145_vm0, %v160_v10, 0.0  ;;  %v165_v17 = vsel %vm145_vm0, %v148_v11, 0.0 }
  0xad   : > { %v213_v21 = vadd.f32 %v205_v14, %v171_v16  ;;  %v207_v22 = vadd.f32 %v199_v15, %v165_v17 }
  0xaf   : > { %v162_v12 = vpop.permute.xlu1 %161  ;;  %v150_v13 = vpop.permute.xlu0 %149 }
  0xb0   : > { %v172_v28 = vsel %vm145_vm0, %v162_v12, 0.0  ;;  %v166_v29 = vsel %vm145_vm0, %v150_v13, 0.0 }
  0xb1   : > { %v214_v39 = vadd.f32 %v206_v25, %v172_v28  ;;  %v208_v40 = vadd.f32 %v200_v26, %v166_v29 }
  0xb3   : > { %v186_v19 = vpop.permute.xlu1 %185  ;;  %v174_v20 = vpop.permute.xlu0 %173 }
  0xb4   : > { %v197_v23 = vsel %vm146_vm1, %v186_v19, 0.0  ;;  %v191_v24 = vsel %vm146_vm1, %v174_v20, 0.0 }
  0xb5   : > { %v781_v27 = vsub.f32 %v191_v24, %v165_v17  ;;  %v787_v30 = vadd.f32 %v213_v21, %v197_v23  ;;  %v789_v31 = vadd.f32 %v207_v22, %v191_v24  ;;  %v793_v35 = vsub.f32 %v197_v23, %v171_v16 }
  0xb7   : > { %v152_v32 = vpop.permute.xlu1 %151  ;;  %v188_v34 = vpop.permute.xlu0 %187  ;;  %v800_v41 = vrot.slane %v781_v27, 1  ;;  %v299_v42 = vadd.f32 %v781_v27, %v781_v27  ;;  %v237_v43 = vrot.slane %v787_v30, 7  ;;  %v368_v44 = vand.u32 2147483647, %v789_v31 }
  0xb8   : > { %v808_v45 = vsel %vm145_vm0, %v152_v32, 0.0  ;;  %v198_v46 = vsel %vm146_vm1, %v188_v34, 0.0  ;;  %v256_v47 = vrot.slane %v787_v30, 1  ;;  %v273_v53 = vrot.slane %v793_v35, 7 }
  0xb9   : > { %v814_v48 = vadd.f32 %v299_v42, %v800_v41  ;;  %v222_v49 = vadd.f32 %v214_v39, %v198_v46  ;;  %v230_v50 = vsub.f32 %v198_v46, %v172_v28  ;;  %v231_v54 = vrot.slane %v789_v31, 7 }
  0xba   : > { %v250_v55 = vrot.slane %v789_v31, 1  ;;  %v267_v56 = vrot.slane %v781_v27, 7  ;;  %v209_v57 = vadd.f32 %v201_v33, %v808_v45  ;;  %v370_v61 = vrot.slane %v368_v44, 1 }
  0xbb   : > { %v816_v51 = vpop.permute.xlu1 %155  ;;  %v154_v52 = vpop.permute.xlu0 %153  ;;  %v238_v58 = vrot.slane %v222_v49, 7  ;;  %v257_v59 = vrot.slane %v222_v49, 1  ;;  %v274_v60 = vrot.slane %v230_v50, 7  ;;  %v823_v62 = vrot.slane %v230_v50, 1 }
  0xbc   : > { %v306_v63 = vadd.f32 %v230_v50, %v230_v50  ;;  %v168_v0 = vsel %vm145_vm0, %v154_v52, 0.0  ;;  %v367_v1 = vand.u32 2147483647, %v814_v48  ;;  %v380_v11 = vand.u32 2147483647, %v222_v49 }
  0xbd   : > { %v242_v2 = vsel %vm241_vm2, %v237_v43, %v238_v58  ;;  %v266_v3 = vsel %vm258_vm3, %v257_v59, %v250_v55  ;;  %v275_v4 = vsel %vm241_vm2, %v273_v53, %v274_v60  ;;  %v282_v7 = vsel %vm241_vm2, %v274_v60, %v267_v56 }
  0xbe   : > { %v314_v8 = vadd.f32 %v306_v63, %v275_v4  ;;  %v330_v10 = vsub.f32 %v242_v2, %v266_v3  ;;  %v298_v12 = vsel %vm258_vm3, %v823_v62, %v800_v41  ;;  %v377_v13 = vadd.f32 %v823_v62, %v230_v50 }
  0xbf   : > { %v176_v5 = vpop.permute.xlu1 %175  ;;  %v158_v6 = vpop.permute.xlu0 %157  ;;  %v249_v15 = vsel %vm241_vm2, %v238_v58, %v231_v54  ;;  %v210_v17 = vadd.f32 %v202_v37, %v168_v0  ;;  %v856_v25 = vsel %vm258_vm3, %v256_v47, %v257_v59  ;;  %v307_v34 = vadd.f32 %v299_v42, %v282_v7 }
  0xc0   : > { %v192_v14 = vsel %vm146_vm1, %v176_v5, 0.0  ;;  %v322_v16 = vadd.f32 %v314_v8, %v298_v12  ;;  %v346_v21 = vand.u32 2147483647, %v330_v10  ;;  %v378_v22 = vadd.f32 %v377_v13, %v823_v62 }
  0xc1   : > { %v216_v19 = vadd.f32 %v208_v40, %v192_v14  ;;  %v224_v20 = vsub.f32 %v192_v14, %v166_v29  ;;  %v170_v23 = vsel %vm145_vm0, %v158_v6, 0.0  ;;  %v372_v63 = vadd.f32 %v370_v61, %v367_v1 }
  0xc2   : > { %v338_v26 = vand.u32 2147483647, %v322_v16  ;;  %v379_v32 = vand.u32 2147483647, %v378_v22  ;;  %v212_v46 = vadd.f32 %v797_v38, %v170_v23 }
  0xc3   : > { %v180_v24 = vpop.permute.xlu1 %179  ;;  %v232_v27 = vrot.slane %v216_v19, 7  ;;  %v251_v28 = vrot.slane %v216_v19, 1  ;;  %v268_v31 = vrot.slane %v224_v20, 7  ;;  %v284_v29 = vrot.slane %v224_v20, 1  ;;  %v178_v37 = vpop.permute.xlu0 %177 }
  0xc4   : > { %v300_v33 = vadd.f32 %v224_v20, %v224_v20  ;;  %v354_v39 = vadd.f32 %v346_v21, %v338_v26  ;;  %v381_v48 = vadd.f32 %v380_v11, %v379_v32  ;;  %v194_v38 = vsel %vm146_vm1, %v180_v24, 0.0 }
  0xc5   : > { %v248_v40 = vsel %vm241_vm2, %v231_v54, %v232_v27  ;;  %v265_v44 = vsel %vm258_vm3, %v250_v55, %v251_v28  ;;  %v281_v49 = vsel %vm241_vm2, %v267_v56, %v268_v31  ;;  %v297_v50 = vsel %vm258_vm3, %v800_v41, %v284_v29 }
  0xc6   : > { %v323_v52 = vsub.f32 %v249_v15, %v265_v44  ;;  %362 = vst [vmem:[%s870_s17 + $0x38] sm:$0xff] %v354_v39  ;;  %v315_v54 = vadd.f32 %v307_v34, %v297_v50  ;;  %v193_v55 = vsel %vm146_vm1, %v178_v37, 0.0  ;;  %v880_v58 = vadd.f32 %v210_v17, %v194_v38 }
  0xc7   : > { %v184_v42 = vpop.permute.xlu1 %183  ;;  %382 = vst [vmem:[%s870_s17 + $0x39] sm:$0x40] %v381_v48  ;;  %v882_v59 = vsub.f32 %v194_v38, %v168_v0  ;;  %v217_v60 = vadd.f32 %v209_v57, %v193_v55  ;;  %v225_v3 = vsub.f32 %v193_v55, %v808_v45  ;;  %v308_v5 = vadd.f32 %v300_v33, %v281_v49  ;;  %v182_v37 = vpop.permute.xlu0 %181 }
  0xc8   : > { %v196_v56 = vsel %vm146_vm1, %v184_v42, 0.0  ;;  %v339_v41 = vand.u32 2147483647, %v323_v52  ;;  %v331_v2 = vand.u32 2147483647, %v315_v54  ;;  %v234_v6 = vrot.slane %v880_v58, 7 }
  0xc9   : > { %v885_v4 = vadd.f32 %v212_v46, %v196_v56  ;;  %v253_v7 = vrot.slane %v880_v58, 1  ;;  %v889_v8 = vsub.f32 %v196_v56, %v170_v23  ;;  %v286_v0 = vrot.slane %v882_v59, 1 }
  0xca   : > { %v347_v10 = vadd.f32 %v339_v41, %v331_v2  ;;  %v233_v11 = vrot.slane %v217_v60, 7  ;;  %v252_v57 = vrot.slane %v217_v60, 1  ;;  %v269_v61 = vrot.slane %v225_v3, 7 }
  0xcb   : > { %v285_v1 = vrot.slane %v225_v3, 1  ;;  %v301_v12 = vadd.f32 %v225_v3, %v225_v3  ;;  %v236_v45 = vrot.slane %v885_v4, 7  ;;  %v169_v17 = vsel %vm145_vm0, %v816_v51, 0.0 }
  0xcc   : > { %355 = vst [vmem:[%s870_s17] sm:$0xff] %v347_v10  ;;  %v898_v13 = vsel %vm241_vm2, %v233_v11, %v234_v6  ;;  %v247_v14 = vsel %vm241_vm2, %v232_v27, %v233_v11  ;;  %v263_v15 = vsel %vm258_vm3, %v252_v57, %v253_v7  ;;  %v264_v16 = vsel %vm258_vm3, %v251_v28, %v252_v57 }
  0xcd   : > { %373 = vst [vmem:[%s870_s17] sm:$0x1] %v372_v63  ;;  %v270_v19 = vrot.slane %v882_v59, 7  ;;  %v280_v20 = vsel %vm241_vm2, %v268_v31, %v269_v61  ;;  %v296_v21 = vsel %vm258_vm3, %v284_v29, %v285_v1  ;;  %v295_v22 = vsel %vm258_vm3, %v285_v1, %v286_v0 }
  0xce   : > { %v309_v23 = vadd.f32 %v301_v12, %v280_v20  ;;  %v316_v24 = vadd.f32 %v308_v5, %v296_v21  ;;  %v324_v26 = vsub.f32 %v248_v40, %v264_v16  ;;  %v325_v27 = vsub.f32 %v247_v14, %v263_v15 }
  0xcf   : > { %v243_v51 = vsel %vm241_vm2, %v236_v45, %v237_v43  ;;  %v255_v28 = vrot.slane %v885_v4, 1  ;;  %v272_v31 = vrot.slane %v889_v8, 7  ;;  %v289_v32 = vrot.slane %v793_v35, 1 }
  0xd0   : > { %v317_v29 = vadd.f32 %v309_v23, %v295_v22  ;;  %v332_v33 = vand.u32 2147483647, %v316_v24  ;;  %v340_v34 = vand.u32 2147483647, %v324_v26  ;;  %v305_v39 = vadd.f32 %v793_v35, %v793_v35 }
  0xd1   : > { %v211_v40 = vadd.f32 %v795_v36, %v169_v17  ;;  %v260_v43 = vsel %vm258_vm3, %v255_v28, %v256_v47  ;;  %v276_v44 = vsel %vm241_vm2, %v272_v31, %v273_v53  ;;  %v302_v46 = vadd.f32 %v882_v59, %v882_v59 }
  0xd2   : > { %v333_v48 = vand.u32 2147483647, %v317_v29  ;;  %v341_v49 = vand.u32 2147483647, %v325_v27  ;;  %v348_v50 = vadd.f32 %v340_v34, %v332_v33  ;;  %v279_v36 = vsel %vm241_vm2, %v269_v61, %v270_v19 }
  0xd3   : > { %v313_v52 = vadd.f32 %v305_v39, %v276_v44  ;;  %v329_v30 = vsub.f32 %v243_v51, %v856_v25  ;;  %v195_v47 = vsel %vm146_vm1, %v182_v37, 0.0  ;;  %v291_v53 = vsel %vm258_vm3, %v289_v32, %v823_v62 }
  0xd4   : > { %v349_v35 = vadd.f32 %v341_v49, %v333_v48  ;;  %356 = vst [vmem:[%s870_s17 + $0x8] sm:$0xff] %v348_v50  ;;  %v219_v42 = vadd.f32 %v211_v40, %v195_v47  ;;  %v227_v54 = vsub.f32 %v195_v47, %v169_v17  ;;  %v288_v38 = vrot.slane %v889_v8, 1 }
  0xd5   : > { %v304_v55 = vadd.f32 %v889_v8, %v889_v8  ;;  %v321_v56 = vadd.f32 %v313_v52, %v291_v53  ;;  %v310_v63 = vadd.f32 %v302_v46, %v279_v36  ;;  %v345_v3 = vand.u32 2147483647, %v329_v30 }
  0xd6   : > { %357 = vst [vmem:[%s870_s17 + $0x10] sm:$0xff] %v349_v35  ;;  %v235_v41 = vrot.slane %v219_v42, 7  ;;  %v254_v25 = vrot.slane %v219_v42, 1  ;;  %v271_v60 = vrot.slane %v227_v54, 7  ;;  %v287_v9 = vrot.slane %v227_v54, 1 }
  0xd7   : > { %v337_v2 = vand.u32 2147483647, %v321_v56  ;;  %v303_v4 = vadd.f32 %v227_v54, %v227_v54  ;;  %v292_v11 = vsel %vm258_vm3, %v288_v38, %v289_v32 }
  0xd8   : > { %v244_v62 = vsel %vm241_vm2, %v235_v41, %v236_v45  ;;  %v245_v5 = vsel %vm241_vm2, %v234_v6, %v235_v41  ;;  %v261_v8 = vsel %vm258_vm3, %v254_v25, %v255_v28  ;;  %v262_v10 = vsel %vm258_vm3, %v253_v7, %v254_v25 }
  0xd9   : > { %v353_v57 = vadd.f32 %v345_v3, %v337_v2  ;;  %v277_v61 = vsel %vm241_vm2, %v271_v60, %v272_v31  ;;  %v278_v6 = vsel %vm241_vm2, %v270_v19, %v271_v60  ;;  %v294_v58 = vsel %vm258_vm3, %v286_v0, %v287_v9 }
  0xda   : > { %v311_v1 = vadd.f32 %v303_v4, %v278_v6  ;;  %v312_v12 = vadd.f32 %v304_v55, %v277_v61  ;;  %v326_v7 = vsub.f32 %v898_v13, %v262_v10  ;;  %v293_v45 = vsel %vm258_vm3, %v287_v9, %v288_v38 }
  0xdb   : > { %361 = vst [vmem:[%s870_s17 + $0x30] sm:$0xff] %v353_v57  ;;  %v318_v14 = vadd.f32 %v310_v63, %v294_v58  ;;  %v327_v15 = vsub.f32 %v245_v5, %v261_v8  ;;  %v328_v16 = vsub.f32 %v244_v62, %v260_v43 }
  0xdc   : > { %v319_v17 = vadd.f32 %v311_v1, %v293_v45  ;;  %v320_v19 = vadd.f32 %v312_v12, %v292_v11  ;;  %v342_v59 = vand.u32 2147483647, %v326_v7 }
  0xdd   : > { %v334_v0 = vand.u32 2147483647, %v318_v14  ;;  %v343_v20 = vand.u32 2147483647, %v327_v15  ;;  %v344_v22 = vand.u32 2147483647, %v328_v16 }
  0xde   : > { %v335_v13 = vand.u32 2147483647, %v319_v17  ;;  %v336_v21 = vand.u32 2147483647, %v320_v19 }
  0xdf   : > { %v350_v18 = vadd.f32 %v342_v59, %v334_v0 }
  0xe0   : > { %v351_v23 = vadd.f32 %v343_v20, %v335_v13  ;;  %v352_v24 = vadd.f32 %v344_v22, %v336_v21 }
  0xe1   : > { %358 = vst [vmem:[%s870_s17 + $0x18] sm:$0xff] %v350_v18 }
  0xe2   : > { %359 = vst [vmem:[%s870_s17 + $0x20] sm:$0xff] %v351_v23  ;;  %360 = vst [vmem:[%s870_s17 + $0x28] sm:$0xff] %v352_v24 }
  0xe3   : > { %581 = shalt.err (!%p578_p1)
}
  0xe4   : > { %s582_s16 = scalar_lea.hbm %s985_s4, 1024  ;;  %s586_s22 = scalar_lea.hbm %s1034_s1, 4096 }
  0xe5   : > { %p583_p3 = scmp.ne.s32.totalorder %s985_s4, %s582_s16  ;;  %p587_p0 = scmp.lt.u32.totalorder %s985_s4, %s1034_s1 }
  0xe6   : > { %p588_p2 = scmp.lt.u32.totalorder %s586_s22, %s582_s16  ;;  %p590_p6 = scmp.lt.u32.totalorder %s582_s16, %s985_s4 }
  0xe7   : > { %p584_p4 = pnand %p583_p3, %p1041_p10 }
  0xe8   : > { %p589_p7 = por %p588_p2, %p587_p0 }
  0xe9   : > { %p585_p5 = pneg %p584_p4 }
  0xea   : > { %p591_p11 = por %p590_p6, %p589_p7 }
  0xec   : > { %p592_p12 = pnand %p591_p11, %p585_p5 }
  0xee   : > { %595 = shalt.err (!%p592_p12)
}
  0xef   : > { %s642_s30 = smov 128   ;;  %s643_s25 = smov 8  }
  0xf0   : > { %488 = dma.vmem_to_hbm [thread:$0]  (%p1041_p10), %s987_s29, 1024, %s985_s4, %s384_s10, %s642_s30, %s642_s30, %s643_s25  }
  0xf1 PF: > { %p499_p8 = scmp.ge.s32.totalorder %s634_s9, 2  ;;  %s412_s27 = sand.u32 1, %s622_s6  }
  0xf2   : > { %p1042_p9 = scmp.ne.s32.totalorder %s1039_s19, 0  ;;  %s413_s17 = scalar_lea.sflag [#allocation4], %s412_s27 }
  0xf4   : > { %p495_p13 = pnand %p499_p8, %p1042_p9 }
  0xf6   : > { %617 = dma.done.wait (!%p495_p13), %s413_s17, 1024  }
  0xf7   : > { %619 = vsyncadd (!%p495_p13), %s413_s17, 4294966272  ;;  %p14_p1 = scmp.ge.s32.totalorder %s679_s12, 6   ;;  %s1043_s6 = smov %s626_s7 }
  0xf8   : > { %s1044_s7 = smov %s630_s8  ;;  %s1045_s8 = smov %s691_s15 }
  0xf9   : > { %s1046_s9 = smov %s679_s12  ;;  %16 = sbr.rel (!%p14_p1) target bundleno = 5 (0x5), region = 69 }
 0x100   :  { %418 = vsyncpa [#allocation3], 1 }
 0x101   :  { %420 = vsyncpa [#allocation3 + $0x1], 1 }
 0x102   :  { %421 = vsyncpa [#allocation4], 1 }
 0x103   :  { %423 = vsyncpa [#allocation4 + $0x1], 1 }

</bundles_post_ra>
